<compile_context>
chip_gen: v5e
topology: v5e:2x2
jax: 0.10.0
libtpu: 0.0.40
codegen_flags: <defaults>
</compile_context>

<pallas_src>
import functools

import jax
import jax.numpy as jnp
from jax import lax
from jax.experimental import pallas as pl
from jax.experimental.pallas import tpu as pltpu

EPS = 1e-5            # nn.InstanceNorm1d default
CELU_ALPHA = 1.0      # nn.CELU default
Y_CACHE_BUDGET_BYTES = 24 * 1024 * 1024   # keep the y-cache well inside v7x's 64 MiB VMEM


def point_block_kernel(x_ref, w_ref, g_ref, beta_ref, o_ref,
                       sum_ref, sumsq_ref, scale_ref, shift_ref,
                       *maybe_ycache,
                       n_total, nt, ragged, cache_y, use_mxu, alpha):
    # Grid: (batch, cout_tile, pass, n_tile)
    #   pass 0: y = W @ x, accumulate sum / sumsq, optionally cache y tiles.
    #   pass 1: finalize stats once, normalize + CELU every tile, store.
    p = pl.program_id(2)
    n = pl.program_id(3)
    ycache_ref = maybe_ycache[0] if cache_y else None

    def conv():
        w = w_ref[...]                     # (tCout, Cin) -- pre-cast in wrapper
        x = x_ref[0]                       # (Cin, Nt)
        if x.dtype != w.dtype:
            x = x.astype(w.dtype)
        if use_mxu:
            # f32 operands keep full f32 accuracy on the MXU; bf16 operands
            # (compute_dtype=bf16) halve MXU passes, accumulation stays f32.
            return jnp.dot(w, x, preferred_element_type=jnp.float32)
        # v5e-style fallback: tiny contraction depth as unrolled broadcast-FMAs.
        cout, cin = w.shape
        acc = jnp.zeros((cout, x.shape[1]), jnp.float32)
        for c in range(cin):               # static unroll, cin small
            acc = acc + (w[:, c:c + 1].astype(jnp.float32)
                         * x[c:c + 1, :].astype(jnp.float32))
        return acc

    @pl.when(p == 0)
    def _pass0():
        y = conv()                                   # (tCout, Nt) f32, bias-free

        @pl.when(n == 0)
        def _init():
            sum_ref[...] = jnp.zeros_like(sum_ref)
            sumsq_ref[...] = jnp.zeros_like(sumsq_ref)

        if ragged:
            lane = lax.broadcasted_iota(jnp.int32, y.shape, 1)
            y_stat = jnp.where(lane < (n_total - n * nt), y, 0.0)
        else:
            y_stat = y
        sum_ref[...] += jnp.sum(y_stat, axis=1, keepdims=True)
        sumsq_ref[...] += jnp.sum(y_stat * y_stat, axis=1, keepdims=True)
        if cache_y:
            ycache_ref[n] = y                        # pass 1 reuses this tile

    @pl.when(p == 1)
    def _pass1():
        @pl.when(n == 0)
        def _finalize_stats():                       # hoisted pass-1 invariants
            inv_n = 1.0 / n_total
            mean = sum_ref[...] * inv_n              # mean of Wx (bias cancels)
            var = jnp.maximum(sumsq_ref[...] * inv_n - mean * mean, 0.0)
            rstd = lax.rsqrt(var + EPS)
            sc = g_ref[...] * rstd
            scale_ref[...] = sc
            shift_ref[...] = beta_ref[...] - mean * sc

        y = ycache_ref[n] if cache_y else conv()
        y_hat = y * scale_ref[...] + shift_ref[...]
        # CELU.  TODO(synk): switch to jnp.expm1 if/when Mosaic lowers it.
        if alpha == 1.0:
            neg = jnp.exp(y_hat) - 1.0
        else:
            neg = alpha * (jnp.exp(y_hat / alpha) - 1.0)
        o_ref[0] = jnp.where(y_hat > 0.0, y_hat, neg).astype(o_ref.dtype)


def _pick_n_tile(n, cin, cout):
    # Larger lane-dense tiles amortize per-step overhead and lengthen DMAs;
    # per-step footprint is only (cin + cout) * nt * 4B * 2 buffers.
    n_pad = ((n + 127) // 128) * 128
    targets = ((4096, 2048, 1024, 512, 256, 128) if max(cin, cout) <= 64
               else (2048, 1024, 512, 256, 128))
    for cand in targets:
        if n_pad >= cand:
            return cand
    return 128


def _pick_cout_tile(cout, batch):
    # Split Cout when the batch axis alone cannot feed both v7x TensorCores
    # (B == 1) or when Cout is large enough to bloat the per-step intermediate.
    if batch > 1 and cout <= 256:
        return cout
    for cand in (256, 128, 64, 32, 16, 8):
        if cout % cand == 0 and cout // cand >= 2:
            return cand
    return cout


def point_block(data, weight, bias, gamma, beta, *, alpha=CELU_ALPHA,
                compute_dtype=None, use_mxu=True,
                y_cache_budget_bytes=Y_CACHE_BUDGET_BYTES):
    """data: (B, Cin, N) float32/bfloat16, PyTorch NCL layout (used natively).

    weight: (Cout, Cin) (or raw Conv1d (Cout, Cin, 1)); bias/gamma/beta: (Cout,)
    bias is accepted for API parity but is mathematically cancelled by
    InstanceNorm (it is constant over N), so it never enters the kernel.
    Returns (B, Cout, N) in data.dtype.
    """
    B, Cin, N = data.shape
    if weight.ndim == 3:
        weight = weight.reshape(weight.shape[0], weight.shape[1])
    Cout = weight.shape[0]
    del bias  # constant over N -> exactly removed by InstanceNorm

    nt = _pick_n_tile(N, Cin, Cout)
    num_n = pl.cdiv(N, nt)
    ragged = (N % nt) != 0
    tcout = _pick_cout_tile(Cout, B)
    num_co = Cout // tcout

    if compute_dtype is None:
        compute_dtype = jnp.bfloat16 if data.dtype == jnp.bfloat16 else jnp.float32
    w2 = weight.astype(compute_dtype)                       # hoisted per-step cast
    g2 = gamma.reshape(Cout, 1).astype(jnp.float32)
    be2 = beta.reshape(Cout, 1).astype(jnp.float32)

    y_cache_bytes = num_n * nt * tcout * 4
    cache_y = y_cache_bytes <= y_cache_budget_bytes

    kernel = functools.partial(
        point_block_kernel, n_total=N, nt=nt, ragged=ragged, cache_y=cache_y,
        use_mxu=use_mxu, alpha=float(alpha))

    if cache_y:
        # Pass 1 points at the block already resident from the last pass-0
        # step, so the pipeliner elides the DMA: x is read from HBM exactly
        # once per (batch, Cout-tile).
        x_map = lambda b, co, p, n: (b, 0, n * (1 - p) + (num_n - 1) * p)
    else:
        x_map = lambda b, co, p, n: (b, 0, n)     # streaming: re-read on pass 1

    scratch = [
        pltpu.VMEM((tcout, 1), jnp.float32),      # sum(Wx)
        pltpu.VMEM((tcout, 1), jnp.float32),      # sum((Wx)^2)
        pltpu.VMEM((tcout, 1), jnp.float32),      # scale = gamma * rstd
        pltpu.VMEM((tcout, 1), jnp.float32),      # shift = beta - mean*scale
    ]
    if cache_y:
        scratch.append(pltpu.VMEM((num_n, tcout, nt), jnp.float32))   # y cache

    blk_bytes = 2 * 4 * (Cin * nt + tcout * nt + tcout * Cin + 3 * tcout * 128)
    vmem_limit = int(min(48 << 20,
                         max(32 << 20,
                             (y_cache_bytes if cache_y else 0)
                             + 2 * blk_bytes + (4 << 20))))

    return pl.pallas_call(
        kernel,
        out_shape=jax.ShapeDtypeStruct((B, Cout, N), data.dtype),
        grid_spec=pltpu.PrefetchScalarGridSpec(
            num_scalar_prefetch=0,
            grid=(B, num_co, 2, num_n),
            in_specs=[
                pl.BlockSpec((1, Cin, nt), x_map),
                pl.BlockSpec((tcout, Cin), lambda b, co, p, n: (co, 0)),
                pl.BlockSpec((tcout, 1), lambda b, co, p, n: (co, 0)),
                pl.BlockSpec((tcout, 1), lambda b, co, p, n: (co, 0)),
            ],
            # Pass-0 steps map to the block the first pass-1 step writes, so a
            # block is flushed to HBM only after pass 1 fills it (see header).
            out_specs=pl.BlockSpec((1, tcout, nt), lambda b, co, p, n: (b, co, n * p)),
            scratch_shapes=scratch,
        ),
        compiler_params=pltpu.CompilerParams(
            # batch & Cout-tile axes are independent (megacore); pass / N-tile
            # axes carry the InstanceNorm accumulator -> arbitrary, innermost.
            dimension_semantics=("parallel", "parallel", "arbitrary", "arbitrary"),
            vmem_limit_bytes=vmem_limit,
        ),
    )(data, w2, g2, be2)


def reference(data, weight, bias, gamma, beta, alpha=CELU_ALPHA):
    """Pure-JAX reference of the PyTorch forward (NCL layout)."""
    y = jnp.einsum('oc,bcn->bon', weight, data,
                   precision=lax.Precision.HIGHEST) + bias[None, :, None]
    mean = jnp.mean(y, axis=2, keepdims=True)
    var = jnp.mean((y - mean) ** 2, axis=2, keepdims=True)
    y_hat = (y - mean) / jnp.sqrt(var + EPS)
    y_hat = y_hat * gamma[None, :, None] + beta[None, :, None]
    return jnp.where(y_hat > 0, y_hat, alpha * jnp.expm1(y_hat / alpha))


if __name__ == "__main__":
    def run_case(name, B, Cin, Cout, N, **kw):
        key = jax.random.PRNGKey(0)
        k_x, k_w, k_b, k_g, k_be = jax.random.split(key, 5)
        data = jax.random.normal(k_x, (B, Cin, N), dtype=jnp.float32)
        weight = jax.random.normal(k_w, (Cout, Cin), dtype=jnp.float32) * 0.5
        bias = jax.random.normal(k_b, (Cout,), dtype=jnp.float32) * 0.1
        gamma = 1.0 + 0.1 * jax.random.normal(k_g, (Cout,), dtype=jnp.float32)
        beta = 0.1 * jax.random.normal(k_be, (Cout,), dtype=jnp.float32)

        out = jax.block_until_ready(point_block(data, weight, bias, gamma, beta, **kw))
        ref = reference(data, weight, bias, gamma, beta)
        assert out.shape == (B, Cout, N), name
        max_err = float(jnp.max(jnp.abs(out - ref)))
        assert jnp.allclose(out, ref, atol=1e-3, rtol=1e-3), (
            f"{name}: mismatch vs reference (max abs err {max_err:.2e})")

    # 1) Aligned N, B=2 (batch axis feeds megacore); y-cache + MXU path.
    run_case("dense", B=2, Cin=4, Cout=8, N=1024)
    # 2) B=1 -> Cout-tile parallel axis (2 tiles of 8); ragged N (600 = 512+88)
    #    -> masked last tile; two N tiles exercise the multi-tile accumulator.
    run_case("ragged_b1", B=1, Cin=6, Cout=16, N=600)
    # 3) Force the streaming (no y-cache) fallback and the v5e VPU conv path.
    run_case("streaming_vpu", B=1, Cin=4, Cout=8, N=384,
             y_cache_budget_bytes=0, use_mxu=False)

    print("KERNEL_OK")
</pallas_src>

<mosaic_0001>
module attributes {stable_mosaic.version = 11 : i64} {
  func.func @point_block_kernel(%arg0: i32, %arg1: i32, %arg2: i32, %arg3: i32, %arg4: memref<1x4x1024xf32, #tpu.memory_space<vmem>>, %arg5: memref<8x4xf32, #tpu.memory_space<vmem>>, %arg6: memref<8x1xf32, #tpu.memory_space<vmem>>, %arg7: memref<8x1xf32, #tpu.memory_space<vmem>>, %arg8: memref<1x8x1024xf32, #tpu.memory_space<vmem>>, %arg9: memref<8x1xf32, #tpu.memory_space<vmem>>, %arg10: memref<8x1xf32, #tpu.memory_space<vmem>>, %arg11: memref<8x1xf32, #tpu.memory_space<vmem>>, %arg12: memref<8x1xf32, #tpu.memory_space<vmem>>, %arg13: memref<1x8x1024xf32, #tpu.memory_space<vmem>>) attributes {dimension_semantics = [#tpu.dimension_semantics<parallel>, #tpu.dimension_semantics<parallel>, #tpu.dimension_semantics<arbitrary>, #tpu.dimension_semantics<arbitrary>], iteration_bounds = array<i64: 2, 1, 2, 1>, scalar_prefetch = 0 : i64, scratch_operands = 5 : i64, tpu.core_type = #tpu.core_type<tc>, window_params = [{transform_indices = @transform_0, window_bounds = array<i64: 1, 4, 1024>}, {transform_indices = @transform_1, window_bounds = array<i64: 8, 4>}, {transform_indices = @transform_2, window_bounds = array<i64: 8, 1>}, {transform_indices = @transform_3, window_bounds = array<i64: 8, 1>}, {transform_indices = @transform_4, window_bounds = array<i64: 1, 8, 1024>}]} {
    %c0_i32 = arith.constant 0 : i32
    %0 = arith.cmpi eq, %arg2, %c0_i32 : i32
    %1 = arith.extui %0 : i1 to i32
    %c0_i32_0 = arith.constant 0 : i32
    %2 = arith.cmpi ne, %1, %c0_i32_0 : i32
    scf.if %2 {
      %c0 = arith.constant 0 : index
      %c0_2 = arith.constant 0 : index
      %6 = vector.load %arg5[%c0, %c0_2] : memref<8x4xf32, #tpu.memory_space<vmem>>, vector<8x4xf32>
      %c0_3 = arith.constant 0 : index
      %c0_4 = arith.constant 0 : index
      %c0_5 = arith.constant 0 : index
      %7 = vector.load %arg4[%c0_3, %c0_4, %c0_5] : memref<1x4x1024xf32, #tpu.memory_space<vmem>>, vector<1x4x1024xf32>
      %8 = vector.shape_cast %7 : vector<1x4x1024xf32> to vector<4x1024xf32>
      %cst = arith.constant dense<0.000000e+00> : vector<8x1024xf32>
      %9 = tpu.matmul %6, %8, %cst {dimension_numbers = #tpu.dot_dimension_numbers<[1], [0], [0], [1], [0, 0, 1, 1], [], []>} : vector<8x4xf32>, vector<4x1024xf32>, vector<8x1024xf32> -> vector<8x1024xf32>
      %c0_i32_6 = arith.constant 0 : i32
      %10 = arith.cmpi eq, %arg3, %c0_i32_6 : i32
      %11 = arith.extui %10 : i1 to i32
      %c0_i32_7 = arith.constant 0 : i32
      %12 = arith.cmpi ne, %11, %c0_i32_7 : i32
      scf.if %12 {
        %cst_20 = arith.constant 0.000000e+00 : f32
        %28 = vector.broadcast %cst_20 : f32 to vector<8x1xf32>
        %c0_21 = arith.constant 0 : index
        %c0_22 = arith.constant 0 : index
        %29 = vector.load %arg9[%c0_21, %c0_22] : memref<8x1xf32, #tpu.memory_space<vmem>>, vector<8x1xf32>
        tpu.vector_store %arg9[%c0_21, %c0_22], %28 {strides = array<i32>} : memref<8x1xf32, #tpu.memory_space<vmem>>, vector<8x1xf32>,
        %cst_23 = arith.constant 0.000000e+00 : f32
        %30 = vector.broadcast %cst_23 : f32 to vector<8x1xf32>
        %c0_24 = arith.constant 0 : index
        %c0_25 = arith.constant 0 : index
        %31 = vector.load %arg10[%c0_24, %c0_25] : memref<8x1xf32, #tpu.memory_space<vmem>>, vector<8x1xf32>
        tpu.vector_store %arg10[%c0_24, %c0_25], %30 {strides = array<i32>} : memref<8x1xf32, #tpu.memory_space<vmem>>, vector<8x1xf32>,
      } else {
      }
      %c0_8 = arith.constant 0 : index
      %c0_9 = arith.constant 0 : index
      %13 = vector.load %arg9[%c0_8, %c0_9] : memref<8x1xf32, #tpu.memory_space<vmem>>, vector<8x1xf32>
      %cst_10 = arith.constant dense<0.000000e+00> : vector<8xf32>
      %14 = vector.multi_reduction <add>, %9, %cst_10 [1] : vector<8x1024xf32> to vector<8xf32>
      %15 = vector.shape_cast %14 : vector<8xf32> to vector<8x1xf32>
      %16 = arith.addf %13, %15 : vector<8x1xf32>
      %c0_11 = arith.constant 0 : index
      %c0_12 = arith.constant 0 : index
      %17 = vector.load %arg9[%c0_11, %c0_12] : memref<8x1xf32, #tpu.memory_space<vmem>>, vector<8x1xf32>
      tpu.vector_store %arg9[%c0_11, %c0_12], %16 {strides = array<i32>} : memref<8x1xf32, #tpu.memory_space<vmem>>, vector<8x1xf32>,
      %c0_13 = arith.constant 0 : index
      %c0_14 = arith.constant 0 : index
      %18 = vector.load %arg10[%c0_13, %c0_14] : memref<8x1xf32, #tpu.memory_space<vmem>>, vector<8x1xf32>
      %19 = arith.mulf %9, %9 : vector<8x1024xf32>
      %cst_15 = arith.constant dense<0.000000e+00> : vector<8xf32>
      %20 = vector.multi_reduction <add>, %19, %cst_15 [1] : vector<8x1024xf32> to vector<8xf32>
      %21 = vector.shape_cast %20 : vector<8xf32> to vector<8x1xf32>
      %22 = arith.addf %18, %21 : vector<8x1xf32>
      %c0_16 = arith.constant 0 : index
      %c0_17 = arith.constant 0 : index
      %23 = vector.load %arg10[%c0_16, %c0_17] : memref<8x1xf32, #tpu.memory_space<vmem>>, vector<8x1xf32>
      tpu.vector_store %arg10[%c0_16, %c0_17], %22 {strides = array<i32>} : memref<8x1xf32, #tpu.memory_space<vmem>>, vector<8x1xf32>,
      %24 = arith.index_cast %arg3 : i32 to index
      %c0_18 = arith.constant 0 : index
      %c0_19 = arith.constant 0 : index
      %25 = vector.load %arg13[%24, %c0_18, %c0_19] : memref<1x8x1024xf32, #tpu.memory_space<vmem>>, vector<1x8x1024xf32>
      %26 = vector.shape_cast %25 : vector<1x8x1024xf32> to vector<8x1024xf32>
      %27 = vector.shape_cast %9 : vector<8x1024xf32> to vector<1x8x1024xf32>
      tpu.vector_store %arg13[%24, %c0_18, %c0_19], %27 {strides = array<i32>} : memref<1x8x1024xf32, #tpu.memory_space<vmem>>, vector<1x8x1024xf32>,
    } else {
    }
    %c1_i32 = arith.constant 1 : i32
    %3 = arith.cmpi eq, %arg2, %c1_i32 : i32
    %4 = arith.extui %3 : i1 to i32
    %c0_i32_1 = arith.constant 0 : i32
    %5 = arith.cmpi ne, %4, %c0_i32_1 : i32
    scf.if %5 {
      %c0_i32_2 = arith.constant 0 : i32
      %6 = arith.cmpi eq, %arg3, %c0_i32_2 : i32
      %7 = arith.extui %6 : i1 to i32
      %c0_i32_3 = arith.constant 0 : i32
      %8 = arith.cmpi ne, %7, %c0_i32_3 : i32
      scf.if %8 {
        %c0_13 = arith.constant 0 : index
        %c0_14 = arith.constant 0 : index
        %27 = vector.load %arg9[%c0_13, %c0_14] : memref<8x1xf32, #tpu.memory_space<vmem>>, vector<8x1xf32>
        %cst_15 = arith.constant 9.765625E-4 : f32
        %28 = vector.broadcast %cst_15 : f32 to vector<8x1xf32>
        %29 = arith.mulf %27, %28 : vector<8x1xf32>
        %c0_16 = arith.constant 0 : index
        %c0_17 = arith.constant 0 : index
        %30 = vector.load %arg10[%c0_16, %c0_17] : memref<8x1xf32, #tpu.memory_space<vmem>>, vector<8x1xf32>
        %cst_18 = arith.constant 9.765625E-4 : f32
        %31 = vector.broadcast %cst_18 : f32 to vector<8x1xf32>
        %32 = arith.mulf %30, %31 : vector<8x1xf32>
        %33 = arith.mulf %29, %29 : vector<8x1xf32>
        %34 = arith.subf %32, %33 : vector<8x1xf32>
        %cst_19 = arith.constant 0.000000e+00 : f32
        %35 = vector.broadcast %cst_19 : f32 to vector<8x1xf32>
        %36 = arith.maximumf %34, %35 : vector<8x1xf32>
        %cst_20 = arith.constant 9.99999974E-6 : f32
        %37 = vector.broadcast %cst_20 : f32 to vector<8x1xf32>
        %38 = arith.addf %36, %37 : vector<8x1xf32>
        %39 = math.rsqrt %38 : vector<8x1xf32>
        %c0_21 = arith.constant 0 : index
        %c0_22 = arith.constant 0 : index
        %40 = vector.load %arg6[%c0_21, %c0_22] : memref<8x1xf32, #tpu.memory_space<vmem>>, vector<8x1xf32>
        %41 = arith.mulf %40, %39 : vector<8x1xf32>
        %c0_23 = arith.constant 0 : index
        %c0_24 = arith.constant 0 : index
        %42 = vector.load %arg11[%c0_23, %c0_24] : memref<8x1xf32, #tpu.memory_space<vmem>>, vector<8x1xf32>
        tpu.vector_store %arg11[%c0_23, %c0_24], %41 {strides = array<i32>} : memref<8x1xf32, #tpu.memory_space<vmem>>, vector<8x1xf32>,
        %c0_25 = arith.constant 0 : index
        %c0_26 = arith.constant 0 : index
        %43 = vector.load %arg7[%c0_25, %c0_26] : memref<8x1xf32, #tpu.memory_space<vmem>>, vector<8x1xf32>
        %44 = arith.mulf %29, %41 : vector<8x1xf32>
        %45 = arith.subf %43, %44 : vector<8x1xf32>
        %c0_27 = arith.constant 0 : index
        %c0_28 = arith.constant 0 : index
        %46 = vector.load %arg12[%c0_27, %c0_28] : memref<8x1xf32, #tpu.memory_space<vmem>>, vector<8x1xf32>
        tpu.vector_store %arg12[%c0_27, %c0_28], %45 {strides = array<i32>} : memref<8x1xf32, #tpu.memory_space<vmem>>, vector<8x1xf32>,
      } else {
      }
      %9 = arith.index_cast %arg3 : i32 to index
      %c0 = arith.constant 0 : index
      %c0_4 = arith.constant 0 : index
      %10 = vector.load %arg13[%9, %c0, %c0_4] : memref<1x8x1024xf32, #tpu.memory_space<vmem>>, vector<1x8x1024xf32>
      %11 = vector.shape_cast %10 : vector<1x8x1024xf32> to vector<8x1024xf32>
      %c0_5 = arith.constant 0 : index
      %c0_6 = arith.constant 0 : index
      %12 = vector.load %arg11[%c0_5, %c0_6] : memref<8x1xf32, #tpu.memory_space<vmem>>, vector<8x1xf32>
      %13 = vector.broadcast %12 : vector<8x1xf32> to vector<8x1024xf32>
      %14 = arith.mulf %11, %13 : vector<8x1024xf32>
      %c0_7 = arith.constant 0 : index
      %c0_8 = arith.constant 0 : index
      %15 = vector.load %arg12[%c0_7, %c0_8] : memref<8x1xf32, #tpu.memory_space<vmem>>, vector<8x1xf32>
      %16 = vector.broadcast %15 : vector<8x1xf32> to vector<8x1024xf32>
      %17 = arith.addf %14, %16 : vector<8x1024xf32>
      %18 = math.exp %17 : vector<8x1024xf32>
      %cst = arith.constant 1.000000e+00 : f32
      %19 = vector.broadcast %cst : f32 to vector<8x1024xf32>
      %20 = arith.subf %18, %19 : vector<8x1024xf32>
      %cst_9 = arith.constant 0.000000e+00 : f32
      %21 = vector.broadcast %cst_9 : f32 to vector<8x1024xf32>
      %22 = arith.cmpf ogt, %17, %21 : vector<8x1024xf32>
      %23 = arith.select %22, %17, %20 : vector<8x1024xi1>, vector<8x1024xf32>
      %c0_10 = arith.constant 0 : index
      %c0_11 = arith.constant 0 : index
      %c0_12 = arith.constant 0 : index
      %24 = vector.load %arg8[%c0_10, %c0_11, %c0_12] : memref<1x8x1024xf32, #tpu.memory_space<vmem>>, vector<1x8x1024xf32>
      %25 = vector.shape_cast %24 : vector<1x8x1024xf32> to vector<8x1024xf32>
      %26 = vector.shape_cast %23 : vector<8x1024xf32> to vector<1x8x1024xf32>
      tpu.vector_store %arg8[%c0_10, %c0_11, %c0_12], %26 {strides = array<i32>} : memref<1x8x1024xf32, #tpu.memory_space<vmem>>, vector<1x8x1024xf32>,
    } else {
    }
    return
  }
  func.func @transform_0(%arg0: i32, %arg1: i32, %arg2: i32, %arg3: i32) -> (i32, i32, i32) {
    %c1_i32 = arith.constant 1 : i32
    %0 = arith.subi %c1_i32, %arg2 : i32
    %1 = arith.muli %arg3, %0 : i32
    %c0_i32 = arith.constant 0 : i32
    %2 = arith.muli %c0_i32, %arg2 : i32
    %3 = arith.addi %1, %2 : i32
    %c0_i32_0 = arith.constant 0 : i32
    %c0_i32_1 = arith.constant 0 : i32
    return %arg0, %c0_i32_0, %3 : i32, i32, i32
  }
  func.func @transform_1(%arg0: i32, %arg1: i32, %arg2: i32, %arg3: i32) -> (i32, i32) {
    %c0_i32 = arith.constant 0 : i32
    %c0_i32_0 = arith.constant 0 : i32
    return %arg1, %c0_i32 : i32, i32
  }
  func.func @transform_2(%arg0: i32, %arg1: i32, %arg2: i32, %arg3: i32) -> (i32, i32) {
    %c0_i32 = arith.constant 0 : i32
    %c0_i32_0 = arith.constant 0 : i32
    return %arg1, %c0_i32 : i32, i32
  }
  func.func @transform_3(%arg0: i32, %arg1: i32, %arg2: i32, %arg3: i32) -> (i32, i32) {
    %c0_i32 = arith.constant 0 : i32
    %c0_i32_0 = arith.constant 0 : i32
    return %arg1, %c0_i32 : i32, i32
  }
  func.func @transform_4(%arg0: i32, %arg1: i32, %arg2: i32, %arg3: i32) -> (i32, i32, i32) {
    %0 = arith.muli %arg3, %arg2 : i32
    %c0_i32 = arith.constant 0 : i32
    return %arg0, %arg1, %0 : i32, i32, i32
  }
}

</mosaic_0001>

<bundles_post_ra>
// kernel: tpu_custom_call.1
= control target key start
LH: loop header
LB: loop body
LE: loop exit
PB: predicated region body
PF: predicated region fallthrough
CT: control target
= control target key end

     0   :  { %s1344_s0 = inlined_call_operand.hbm [shape: f32[2,4,1024], index: 0, kind: input, shape index: {}]   ;;  %s1345_s1 = inlined_call_operand.vmem [shape: f32[8,4], index: 1, kind: input, shape index: {}]   ;;  %s1346_s2 = inlined_call_operand.vmem [shape: f32[8,1], index: 2, kind: input, shape index: {}]   ;;  %s1347_s3 = inlined_call_operand.vmem [shape: f32[8,1], index: 3, kind: input, shape index: {}]   ;;  %s1348_s4 = inlined_call_operand.hbm [shape: f32[2,8,1024], index: 4, kind: output, shape index: {}]  }
   0x1   :  { %1349 = sst [smem:[#allocation13_spill]] %s1344_s0 }
   0x2   :  { %9 = vsyncpa [#allocation8], 0 }
   0x3   :  { %11 = vsyncpa [#allocation8 + $0x1], 0 }
   0x4   :  { %12 = vsyncpa [#allocation9], 0 }
   0x5   :  { %14 = vsyncpa [#allocation9 + $0x1], 0  ;;  %s1163_s15 = smov 0   ;;  %s1165_s16 = smov 0  }
   0x6   :  { %s1167_s17 = smov 0   ;;  %s1169_s18 = smov 0  }
   0x7   :  { %s1171_s19 = smov 0   ;;  %s1173_s20 = smov 0  }
   0x8   :  { %s1175_s21 = smov 0   ;;  %s1177_s22 = smov 0  }
   0x9 LB: > { %s861_s23 = sadd.s32 4294967295, %s1134_s22   ;;  %s862_s24 = sadd.s32 4294967294, %s1134_s22   ;;  %s1134_s22 = sphi %s1177_s22, %s20_s22   ;;  %s1130_s21 = sphi %s1175_s21, %s1361_s21   ;;  %s1126_s20 = sphi %s1173_s20, %s1360_s20   ;;  %s1122_s19 = sphi %s1171_s19, %s1359_s19   ;;  %s1118_s18 = sphi %s1169_s18, %s1358_s18   ;;  %s1114_s17 = sphi %s1167_s17, %s1357_s17   ;;  %s1110_s16 = sphi %s1165_s16, %s1356_s16   ;;  %s1106_s15 = sphi %s1163_s15, %s1355_s15  }
   0xa   : > { %s38_s25 = sadd.s32 1, %s1126_s20  ;;  %s46_s26 = sadd.s32 1, %s1130_s21 }
   0xb   : > { %p40_p0 = scmp.ge.s32.totalorder %s38_s25, 2  ;;  %s59_s27 = sadd.s32 1, %s1114_s17 }
   0xc   : > { %p66_p1 = scmp.ne.s32.totalorder %s1114_s17, %s1110_s16  ;;  %p67_p2 = scmp.eq.s32.totalorder %s1134_s22, 0 }
   0xd   : > { %s1363_s25 = smov (%p40_p0, %s38_s25), 0  ;;  %s1365_s26 = smov (!%p40_p0, %s46_s26), %s1130_s21 }
   0xe   : > { %p1214_p3 = por %p67_p2, %p66_p1  ;;  %p72_p4 = scmp.ne.s32.totalorder %s1110_s16, %s1106_s15 }
   0xf   : > { %p48_p5 = scmp.ge.s32.totalorder %s1365_s26, 2  ;;  %p73_p6 = scmp.eq.s32.totalorder %s861_s23, 0 }
  0x10   : > { %p180_p7 = scmp.eq.s32.totalorder %s861_s23, 3  ;;  %p186_p8 = scmp.eq.s32.totalorder %s862_s24, 3 }
  0x11   : > { %s1367_s26 = smov (%p48_p5, %s1365_s26), 0  ;;  %p1222_p9 = por %p73_p6, %p72_p4 }
  0x12   : > { %p1226_p10 = por %p180_p7, %p66_p1  ;;  %s54_s5 = ssub.s32 %s1130_s21, %s1367_s26 }
  0x13   : > { %p1232_p11 = por %p186_p8, %p72_p4  ;;  %p57_p12 = scmp.eq.s32.totalorder %s54_s5, 0 }
  0x14   : > { %p919_p13 = scmp.lt.s32.totalorder %s1134_s22, 4  ;;  %s227_s7 = sand.u32 1, %s1114_s17  }
  0x15   : > { %s1239_s8 = scalar_select %p57_p12, %s1114_s17, %s59_s27  }
  0x16   : > { %s868_s9 = sshll.u32 %s227_s7, 5  ;;  %s905_s10 = sshll.u32 %s1130_s21, 5 }
  0x17   : > { %s1354_s0 = sld [smem:[#allocation13_spill]]  ;;  %s231_s14 = scalar_lea.vmem [#allocation7], %s868_s9 }
  0x18   : > { %s244_s23 = sshll.u32 %s231_s14, 4  ;;  %p912_p0 = pnand %p919_p13, %p1214_p3  ;;  %s245_s23 = int_to_ptr.vmem [resolvable:$true] %s244_s23 }
  0x19   : > { %p871_p1 = scmp.ge.s32.totalorder %s1134_s22, 1  ;;  %p249_p2 = scmp.lt.s32.totalorder %s1134_s22, 5 }
  0x1a   : > { %s228_s5 = scalar_lea.sflag [#allocation8], %s227_s7 }
  0x1b   : > { %p250_p4 = pnand %p871_p1, %p249_p2 }
  0x1c   : > { %s1250_s27 = sand.u32 (!%p250_p4), 1, %s1110_s16  }
  0x1d   : > { %s240_s13 = scalar_lea.hbm %s1354_s0, %s905_s10  ;;  %253 = sbr.rel (%p250_p4) target bundleno = 529 (0x211), region = 36 }
  0x1e   : > { %s242_s24 = sshll.u32 %s240_s13, 4  ;;  %s872_s10 = sshll.u32 (!%p250_p4), %s1250_s27, 5  ;;  %s243_s24 = int_to_ptr.hbm [resolvable:$true] %s242_s24 }
  0x1f   : > { %914 = dma.hbm_to_vmem [thread:$0]  (!%p912_p0), %s243_s24, 512, %s245_s23, %s228_s5  }
  0x20   : > { %s256_s9 = scalar_lea.sflag (!%p250_p4), [#allocation8], %s1250_s27  ;;  %s259_s11 = scalar_lea.vmem (!%p250_p4), [#allocation7], %s872_s10 }
  0x22   : > { %1097 = dma.done.wait (%p1222_p9), %s256_s9, 512  }
  0x23   : > { %1099 = vsyncadd (%p1222_p9), %s256_s9, 4294966784  ;;  %s873_s28 = sshll.u32 %s1250_s27, 6  ;;  %p874_p3 = scmp.ne.s32.totalorder %s1118_s18, 0 }
  0x24   : > { %s1259_s7 = scalar_lea.vmem [#allocation10], %s873_s28 }
  0x25   : > { %317 = sbr.rel (%p874_p3) target bundleno = 323 (0x143), region = 44 }
  0x2a   : > { %v320_v0 = vld [vmem:[%s259_s11 + $0x8] sm:$0xff]  ;;  %v322_v1 = vld [vmem:[%s259_s11 + $0x18] sm:$0xff]  ;;  %v319_v2 = vld [vmem:[%s259_s11] sm:$0xff]  ;;  %vm346_vm0 = vcmask 1043456   ;;  %vm342_vm1 = vcmask 31744   ;;  %vm527_vm2 = vcmask 7168  }
  0x2b   : > { %329 = vst [vmem:[#allocation1 + $0x10] ss:$2 sm:$0xff] %v320_v0  ;;  %v321_v3 = vld [vmem:[%s259_s11 + $0x10] sm:$0xff]  ;;  %v318_v4 = vld [vmem:[%s1345_s1] sm:$0xff]  ;;  %v1136_v13 = vmov 0.0  }
  0x2c   : > { %333 = vst [vmem:[#allocation1 + $0x30] ss:$2 sm:$0xff] %v322_v1 }
  0x2d   : > { %327 = vst [vmem:[#allocation1] ss:$2 sm:$0xff] %v319_v2 }
  0x2e   : > { %331 = vst [vmem:[#allocation1 + $0x20] ss:$2 sm:$0xff] %v321_v3 }
  0x2f   : > { %528 = vst.msk [vmem:[#allocation2] sm:$0xff] %vm527_vm2, %v1136_v13 }
  0x30   : > { %529 = vst.msk [vmem:[#allocation3] sm:$0xff] %vm527_vm2, %v1136_v13 }
  0x32   : > { %v336_v5 = vld.sshfl [vmem:[#allocation1 + $0x10] sm:$0xff pattern:$0x75316420]  ;;  %v337_v6 = vld.sshfl [vmem:[#allocation1 + $0x18] sm:$0xff pattern:$0x75316420] }
  0x33   : > { %879 = vmatpush.msk.msra.mxu2 %vm346_vm0, %v336_v5  ;;  %v340_v7 = vld.sshfl [vmem:[#allocation1 + $0x30] sm:$0xff pattern:$0x75316420]  ;;  %881 = vmatpush.msk.msra.mxu3 %vm346_vm0, %v337_v6  ;;  %v341_v8 = vld.sshfl [vmem:[#allocation1 + $0x38] sm:$0xff pattern:$0x75316420] }
  0x34   : > { %880 = vmatmul.msk.f32.vlgmr.msra.gmra.mxu2 %vm342_vm1, %v318_v4  ;;  %v334_v9 = vld.sshfl [vmem:[#allocation1] sm:$0xff pattern:$0x75316420]  ;;  %v335_v10 = vld.sshfl [vmem:[#allocation1 + $0x8] sm:$0xff pattern:$0x75316420]  ;;  %882 = vmatmul.msk.f32.vlgmr.msra.gmra.mxu3 %vm342_vm1, %v318_v4 }
  0x35   : > { %887 = vmatpush.msk.msrb.mxu2 %vm346_vm0, %v340_v7  ;;  %875 = vmatpush.msk.msra.mxu0 %vm346_vm0, %v334_v9  ;;  %v338_v11 = vld.sshfl [vmem:[#allocation1 + $0x20] sm:$0xff pattern:$0x75316420]  ;;  %v339_v12 = vld.sshfl [vmem:[#allocation1 + $0x28] sm:$0xff pattern:$0x75316420] }
  0x36   : > { %877 = vmatpush.msk.msra.mxu1 %vm346_vm0, %v335_v10  ;;  %876 = vmatmul.msk.f32.vlgmr.msra.gmra.mxu0 %vm342_vm1, %v318_v4  ;;  %v530_v44 = vld [vmem:[#allocation2] sm:$0xff] }
  0x37   : > { %878 = vmatmul.msk.f32.vlgmr.msra.gmra.mxu1 %vm342_vm1, %v318_v4  ;;  %883 = vmatpush.msk.msrb.mxu0 %vm346_vm0, %v338_v11  ;;  %v543_v47 = vld [vmem:[#allocation3] sm:$0xff] }
  0x38   : > { %889 = vmatpush.msk.msrb.mxu3 %vm346_vm0, %v341_v8  ;;  %885 = vmatpush.msk.msrb.mxu1 %vm346_vm0, %v339_v12 }
  0x3c   : > { %888 = vmatmul.msk.f32.vlgmr.msrb.gmra.mxu2 %vm342_vm1, %v318_v4  ;;  %890 = vmatmul.msk.f32.vlgmr.msrb.gmra.mxu3 %vm342_vm1, %v318_v4 }
  0x3e   : > { %884 = vmatmul.msk.f32.vlgmr.msrb.gmra.mxu0 %vm342_vm1, %v318_v4 }
  0x3f   : > { %886 = vmatmul.msk.f32.vlgmr.msrb.gmra.mxu1 %vm342_vm1, %v318_v4 }
  0xb3   : > { %v380_v14 = vpop.f32.mrf.mxu0 }
  0xb4   : > { %v544_v15 = vmul.f32 %v380_v14, %v380_v14  ;;  %566 = vst [vmem:[#allocation6 + $0x30] sm:$0xff] %v380_v14  ;;  %v400_v16 = vpop.f32.mrf.mxu1 }
  0xb5   : > { %v545_v17 = vmul.f32 %v400_v16, %v400_v16  ;;  %567 = vst [vmem:[#allocation6] sm:$0xff] %v400_v16  ;;  %v531_v18 = vadd.f32 %v400_v16, %v380_v14 }
  0xb7   : > { %v420_v19 = vpop.f32.mrf.mxu2  ;;  %v440_v20 = vpop.f32.mrf.mxu3  ;;  %v552_v21 = vadd.f32 %v545_v17, %v544_v15 }
  0xb8   : > { %v532_v22 = vadd.f32 %v531_v18, %v420_v19  ;;  %v546_v23 = vmul.f32 %v420_v19, %v420_v19  ;;  %568 = vst [vmem:[#allocation6 + $0x18] sm:$0xff] %v420_v19  ;;  %v547_v24 = vmul.f32 %v440_v20, %v440_v20 }
  0xb9   : > { %569 = vst [vmem:[#allocation6 + $0x10] sm:$0xff] %v440_v20 }
  0xba   : > { %v553_v25 = vadd.f32 %v552_v21, %v546_v23  ;;  %v533_v26 = vadd.f32 %v532_v22, %v440_v20 }
  0xbb   : > { %v460_v27 = vpop.f32.mrf.mxu0 }
  0xbc   : > { %v554_v28 = vadd.f32 %v553_v25, %v547_v24  ;;  %v534_v29 = vadd.f32 %v533_v26, %v460_v27  ;;  %v548_v30 = vmul.f32 %v460_v27, %v460_v27  ;;  %570 = vst [vmem:[#allocation6 + $0x8] sm:$0xff] %v460_v27  ;;  %v480_v31 = vpop.f32.mrf.mxu1 }
  0xbd   : > { %571 = vst [vmem:[#allocation6 + $0x20] sm:$0xff] %v480_v31  ;;  %v549_v34 = vmul.f32 %v480_v31, %v480_v31 }
  0xbe   : > { %v555_v32 = vadd.f32 %v554_v28, %v548_v30  ;;  %v535_v33 = vadd.f32 %v534_v29, %v480_v31 }
  0xbf   : > { %v500_v35 = vpop.f32.mrf.mxu2  ;;  %v520_v36 = vpop.f32.mrf.mxu3 }
  0xc0   : > { %v536_v37 = vadd.f32 %v535_v33, %v500_v35  ;;  %572 = vst [vmem:[#allocation6 + $0x28] sm:$0xff] %v500_v35  ;;  %v556_v38 = vadd.f32 %v555_v32, %v549_v34  ;;  %v550_v39 = vmul.f32 %v500_v35, %v500_v35  ;;  %v551_v41 = vmul.f32 %v520_v36, %v520_v36 }
  0xc1   : > { %573 = vst [vmem:[#allocation6 + $0x38] sm:$0xff] %v520_v36 }
  0xc2   : > { %v537_v40 = vadd.f32 %v536_v37, %v520_v36  ;;  %v557_v42 = vadd.f32 %v556_v38, %v550_v39 }
  0xc4   : > { %538 = vadd.xlane.f32.xlu0 %v537_v40  ;;  %v558_v43 = vadd.f32 %v557_v42, %v551_v41 }
  0xcc   : > { %559 = vadd.xlane.f32.xlu0 %v558_v43 }
 0x137   : > { %v539_v45 = vpop.xlane.xlu0 %538 }
 0x138   : > { %v540_v46 = vadd.f32 %v539_v45, %v530_v44 }
 0x13a   : > { %542 = vst.msk [vmem:[#allocation2] sm:$0xff] %vm527_vm2, %v540_v46 }
 0x13f   : > { %v560_v48 = vpop.xlane.xlu0 %559 }
 0x140   : > { %v561_v49 = vadd.f32 %v560_v48, %v543_v47 }
 0x142   : > { %562 = vst.msk [vmem:[#allocation3] sm:$0xff] %vm527_vm2, %v561_v49 }
 0x143 PF: > { %p891_p5 = scmp.ne.s32.totalorder %s1118_s18, 1 }
 0x145   : > { %577 = sbr.rel (%p891_p5) target bundleno = 514 (0x202), region = 52 }
 0x14a   : > { %v582_v50 = vld [vmem:[#allocation2] sm:$0xff]  ;;  %v584_v51 = vld [vmem:[#allocation3] sm:$0xff]  ;;  %v1137_v52 = vmov 0   ;;  %v600_v1 = vld [vmem:[%s1346_s2] sm:$0xff]  ;;  %vm602_vm6 = vcmask 7168  }
 0x14b   : > { %987 = vset.pattern.permute.xlu0 %v1137_v52  ;;  %v583_v53 = vmul.f32 0.0009765625, %v582_v50  ;;  %v585_v54 = vmul.f32 0.0009765625, %v584_v51  ;;  %v604_v4 = vld [vmem:[%s1347_s3] sm:$0xff]  ;;  %v611_v10 = vld [vmem:[#allocation6 + $0x30] sm:$0xff]  ;;  %v612_v11 = vld [vmem:[#allocation6] sm:$0xff] }
 0x14c   : > { %v613_v12 = vld [vmem:[#allocation6 + $0x18] sm:$0xff]  ;;  %v614_v13 = vld [vmem:[#allocation6 + $0x10] sm:$0xff]  ;;  %v615_v14 = vld [vmem:[#allocation6 + $0x8] sm:$0xff] }
 0x14d   : > { %v586_v55 = vmul.f32 %v583_v53, %v583_v53  ;;  %v616_v15 = vld [vmem:[#allocation6 + $0x20] sm:$0xff]  ;;  %v617_v16 = vld [vmem:[#allocation6 + $0x28] sm:$0xff]  ;;  %v618_v17 = vld [vmem:[#allocation6 + $0x38] sm:$0xff] }
 0x14f   : > { %v587_v56 = vsub.f32 %v585_v54, %v586_v55 }
 0x151   : > { %v588_v57 = vmax.f32 %v587_v56, 0.0 }
 0x153   : > { %v589_v58 = vadd.f32 1e-05, %v588_v57 }
 0x155   : > { %988 = vrsqrt.f32 %v589_v58  ;;  %vm596_vm3 = vweird.f32 %v589_v58 }
 0x15b   : > { %v989_v59 = vpop.eup %988 }
 0x15c   : > { %v591_v60 = vmul.f32 %v989_v59, %v589_v58  ;;  %vm597_vm4 = vweird.f32 %v989_v59 }
 0x15d   : > { %vm598_vm5 = vmor %vm596_vm3, %vm597_vm4 }
 0x15e   : > { %v592_v61 = vmul.f32 %v989_v59, %v591_v60 }
 0x160   : > { %v593_v62 = vmul.f32 0.5, %v592_v61 }
 0x162   : > { %v594_v63 = vsub.f32 1.5, %v593_v62 }
 0x164   : > { %v595_v0 = vmul.f32 %v989_v59, %v594_v63 }
 0x166   : > { %v599_v2 = vsel %vm598_vm5, %v989_v59, %v595_v0 }
 0x167   : > { %v601_v3 = vmul.f32 %v600_v1, %v599_v2 }
 0x169   : > { %603 = vst.msk [vmem:[#allocation4] sm:$0xff] %vm602_vm6, %v601_v3  ;;  %v605_v5 = vmul.f32 %v601_v3, %v583_v53 }
 0x16b   : > { %v606_v6 = vsub.f32 %v604_v4, %v605_v5 }
 0x16d   : > { %607 = vst.msk [vmem:[#allocation5] sm:$0xff] %vm602_vm6, %v606_v6 }
 0x170   : > { %v619_v7 = vld [vmem:[#allocation4] sm:$0xff] }
 0x171   : > { %622 = vperm.xlu0 %987, %v619_v7  }
 0x174   : > { %v633_v8 = vld [vmem:[#allocation5] sm:$0xff] }
 0x179   : > { %636 = vperm.xlu0 %987, %v633_v8  }
 0x1e3   : > { %v623_v9 = vpop.permute.xlu0 %622 }
 0x1e4   : > { %v625_v18 = vmul.f32 %v623_v9, %v611_v10  ;;  %v626_v19 = vmul.f32 %v623_v9, %v612_v11  ;;  %v627_v20 = vmul.f32 %v623_v9, %v613_v12  ;;  %v628_v21 = vmul.f32 %v623_v9, %v614_v13 }
 0x1e5   : > { %v629_v22 = vmul.f32 %v623_v9, %v615_v14  ;;  %v630_v23 = vmul.f32 %v623_v9, %v616_v15  ;;  %v631_v24 = vmul.f32 %v623_v9, %v617_v16  ;;  %v632_v30 = vmul.f32 %v623_v9, %v618_v17 }
 0x1eb   : > { %v637_v25 = vpop.permute.xlu0 %636 }
 0x1ec   : > { %v639_v26 = vadd.f32 %v637_v25, %v625_v18  ;;  %v640_v27 = vadd.f32 %v637_v25, %v626_v19  ;;  %v641_v28 = vadd.f32 %v637_v25, %v627_v20  ;;  %v642_v29 = vadd.f32 %v637_v25, %v628_v21 }
 0x1ed   : > { %v643_v31 = vadd.f32 %v637_v25, %v629_v22  ;;  %v644_v32 = vadd.f32 %v637_v25, %v630_v23  ;;  %v645_v33 = vadd.f32 %v637_v25, %v631_v24  ;;  %v646_v37 = vadd.f32 %v637_v25, %v632_v30 }
 0x1ee   : > { %v647_v34 = vmul.f32 1.442695, %v639_v26  ;;  %v649_v35 = vmul.f32 1.442695, %v640_v27  ;;  %v651_v36 = vmul.f32 1.442695, %v641_v28 }
 0x1ef   : > { %v653_v38 = vmul.f32 1.442695, %v642_v29  ;;  %v655_v39 = vmul.f32 1.442695, %v643_v31  ;;  %v657_v40 = vmul.f32 1.442695, %v644_v32 }
 0x1f0   : > { %990 = vpow2.f32 %v647_v34  ;;  %v659_v41 = vmul.f32 1.442695, %v645_v33  ;;  %v661_v42 = vmul.f32 1.442695, %v646_v37  ;;  %vm671_vm7 = vcmp.gt.f32.partialorder %v639_v26, 0.0 }
 0x1f1   : > { %992 = vpow2.f32 %v649_v35  ;;  %vm672_vm8 = vcmp.gt.f32.partialorder %v640_v27, 0.0  ;;  %vm673_vm9 = vcmp.gt.f32.partialorder %v641_v28, 0.0  ;;  %vm674_vm10 = vcmp.gt.f32.partialorder %v642_v29, 0.0 }
 0x1f2   : > { %994 = vpow2.f32 %v651_v36  ;;  %vm675_vm11 = vcmp.gt.f32.partialorder %v643_v31, 0.0  ;;  %vm676_vm12 = vcmp.gt.f32.partialorder %v644_v32, 0.0  ;;  %vm677_vm13 = vcmp.gt.f32.partialorder %v645_v33, 0.0 }
 0x1f3   : > { %996 = vpow2.f32 %v653_v38  ;;  %vm678_vm14 = vcmp.gt.f32.partialorder %v646_v37, 0.0 }
 0x1f4   : > { %998 = vpow2.f32 %v655_v39 }
 0x1f5   : > { %1000 = vpow2.f32 %v657_v40 }
 0x1f6   : > { %v991_v43 = vpop.eup %990  ;;  %1002 = vpow2.f32 %v659_v41 }
 0x1f7   : > { %v993_v44 = vpop.eup %992  ;;  %1004 = vpow2.f32 %v661_v42  ;;  %v892_v45 = vadd.f32 -1.0, %v991_v43 }
 0x1f8   : > { %v995_v46 = vpop.eup %994  ;;  %v893_v47 = vadd.f32 -1.0, %v993_v44 }
 0x1f9   : > { %v997_v48 = vpop.eup %996  ;;  %v894_v49 = vadd.f32 -1.0, %v995_v46  ;;  %v679_v50 = vsel %vm671_vm7, %v639_v26, %v892_v45 }
 0x1fa   : > { %v999_v51 = vpop.eup %998  ;;  %v895_v52 = vadd.f32 -1.0, %v997_v48  ;;  %v680_v53 = vsel %vm672_vm8, %v640_v27, %v893_v47  ;;  %687 = vst [vmem:[%s1259_s7] sm:$0xff] %v679_v50 }
 0x1fb   : > { %v1001_v54 = vpop.eup %1000  ;;  %v896_v55 = vadd.f32 -1.0, %v999_v51  ;;  %v681_v56 = vsel %vm673_vm9, %v641_v28, %v894_v49  ;;  %688 = vst [vmem:[%s1259_s7 + $0x8] sm:$0xff] %v680_v53 }
 0x1fc   : > { %v1003_v57 = vpop.eup %1002  ;;  %v897_v58 = vadd.f32 -1.0, %v1001_v54  ;;  %v682_v59 = vsel %vm674_vm10, %v642_v29, %v895_v52  ;;  %689 = vst [vmem:[%s1259_s7 + $0x10] sm:$0xff] %v681_v56 }
 0x1fd   : > { %v1005_v60 = vpop.eup %1004  ;;  %v898_v61 = vadd.f32 -1.0, %v1003_v57  ;;  %v683_v62 = vsel %vm675_vm11, %v643_v31, %v896_v55  ;;  %690 = vst [vmem:[%s1259_s7 + $0x18] sm:$0xff] %v682_v59 }
 0x1fe   : > { %v899_v63 = vadd.f32 -1.0, %v1005_v60  ;;  %v684_v0 = vsel %vm676_vm12, %v644_v32, %v897_v58  ;;  %691 = vst [vmem:[%s1259_s7 + $0x20] sm:$0xff] %v683_v62 }
 0x1ff   : > { %v685_v1 = vsel %vm677_vm13, %v645_v33, %v898_v61  ;;  %692 = vst [vmem:[%s1259_s7 + $0x28] sm:$0xff] %v684_v0 }
 0x200   : > { %v686_v2 = vsel %vm678_vm14, %v646_v37, %v899_v63  ;;  %693 = vst [vmem:[%s1259_s7 + $0x30] sm:$0xff] %v685_v1 }
 0x201   : > { %694 = vst [vmem:[%s1259_s7 + $0x38] sm:$0xff] %v686_v2 }
 0x202 PF: > { %s906_s24 = sshll.u32 %s1122_s19, 6  ;;  %s714_s11 = sshll.u32 %s1259_s7, 4  ;;  %s715_s11 = int_to_ptr.vmem [resolvable:$true] %s714_s11 }
 0x203   : > { %s712_s9 = scalar_lea.hbm %s1348_s4, %s906_s24  ;;  %s696_s12 = scalar_lea.sflag [#allocation9], %s1250_s27 }
 0x204   : > { %s716_s28 = sshll.u32 %s712_s9, 4  ;;  %s1056_s19 = scalar_lea.hbm %s1348_s4, 128  ;;  %s717_s28 = int_to_ptr.hbm [resolvable:$true] %s716_s28 }
 0x205   : > { %s1050_s13 = sshra.s32 %s717_s28, 4  ;;  %s1051_s13 = int_to_ptr.hbm [resolvable:$true] %s1050_s13 }
 0x206   : > { %s1052_s18 = scalar_lea.hbm %s1051_s13, 64  ;;  %p1057_p9 = scmp.lt.s32.totalorder %s1051_s13, %s1348_s4 }
 0x207   : > { %p1053_p6 = scmp.ne.s32.totalorder %s1051_s13, %s1052_s18  ;;  %p1058_p12 = scmp.lt.s32.totalorder %s1056_s19, %s1052_s18 }
 0x209   : > { %p1054_p7 = pnand %p1053_p6, %p1226_p10  ;;  %p1059_p13 = por %p1058_p12, %p1057_p9 }
 0x20b   : > { %p1055_p8 = pneg %p1054_p7 }
 0x20d   : > { %p1060_p0 = pnand %p1059_p13, %p1055_p8 }
 0x20f   : > { %1063 = shalt.err (!%p1060_p0)
}
 0x210   : > { %909 = dma.vmem_to_hbm [thread:$0]  (%p1226_p10), %s715_s11, 1024, %s717_s28, %s696_s12  }
 0x211 PF: > { %p920_p1 = scmp.ge.s32.totalorder %s1134_s22, 2  ;;  %s728_s27 = sand.u32 1, %s1106_s15  }
 0x212   : > { %s729_s7 = scalar_lea.sflag [#allocation9], %s728_s27 }
 0x213   : > { %p916_p2 = pnand %p920_p1, %p1232_p11 }
 0x215   : > { %p917_p4 = pneg %p916_p2 }
 0x217   : > { %1101 = dma.done.wait (%p917_p4), %s729_s7, 1024  }
 0x218   : > { %1103 = vsyncadd (%p917_p4), %s729_s7, 4294966272  ;;  %s20_s22 = sadd.s32 1, %s1134_s22   ;;  %s1355_s15 = smov %s1110_s16 }
 0x219   : > { %p17_p3 = scmp.ge.s32.totalorder %s20_s22, 6   ;;  %s1356_s16 = smov %s1114_s17 }
 0x21a   : > { %s1357_s17 = smov %s1239_s8  ;;  %s1358_s18 = smov %s1126_s20 }
 0x21b   : > { %s1359_s19 = smov %s1130_s21  ;;  %s1360_s20 = smov %s1363_s25 }
 0x21c   : > { %s1361_s21 = smov %s1367_s26  ;;  %19 = sbr.rel (!%p17_p3) target bundleno = 9 (0x9), region = 111 }
 0x221   :  { %735 = vsyncpa [#allocation8], 1 }
 0x222   :  { %737 = vsyncpa [#allocation8 + $0x1], 1 }
 0x223   :  { %738 = vsyncpa [#allocation9], 1 }
 0x224   :  { %740 = vsyncpa [#allocation9 + $0x1], 1 }

</bundles_post_ra>
